<compile_context>
chip_gen: v7x
topology: tpu7x:2x2x1
jax: 0.10.0
libtpu: 0.0.40
codegen_flags: <defaults>
</compile_context>

<pallas_src>
import jax
import jax.numpy as jnp
from jax.experimental import pallas as pl
from jax.experimental.pallas import tpu as pltpu

_MAX_TILE_BYTES = 4 * 1024 * 1024      # per array per block; 6 buffers -> 24 MiB
_VMEM_LIMIT_BYTES = 32 * 1024 * 1024   # safe scoped-VMEM limit on v5e/v6e/v7x
_TINY_BYPASS_ELEMS = 4096              # below ~4 vregs, fused XLA wins
_MAX_LANE_WIDTH = 32768                # cap for lane-dense reshape width


def _tanh_backward_kernel(grad_ref, out_ref, res_ref):
    g = grad_ref[...]
    o = out_ref[...]
    # grad_input = grad_out * (1 - output^2)
    res_ref[...] = g * (1.0 - o * o)


def _lane_dense_dims(M: int, N: int):
    """If N is not 128-aligned but M*N is, return a lane-dense (rows, L) view."""
    total = M * N
    if N % 128 == 0 or total % 128 != 0:
        return None
    k_max = min(_MAX_LANE_WIDTH // 128, total // 128)
    for k in range(k_max, 0, -1):
        lane = 128 * k
        if total % lane == 0:
            return (total // lane, lane)
    return None


def _choose_tiles(M: int, N: int, *, dtype_bytes: int = 4,
                  max_tile_bytes: int = _MAX_TILE_BYTES):
    """Pick a lane-dense, row-contiguous block.

    Lane dim: full row whenever at least 8 rows fit the byte budget (one
    contiguous HBM slab per block); only split truly enormous rows, and then
    on a 128 boundary.  Sublane dim: as many rows as fit (multiple of 8), or
    the full dim.  Finally, if the whole array fits one block, split it in two
    so v7x's two TensorCores both get work via "parallel" grid semantics.
    """
    if N * dtype_bytes * 8 <= max_tile_bytes:
        tile_n = N                                      # full dim: layout-legal
    else:
        tile_n = max(128, (max_tile_bytes // (8 * dtype_bytes) // 128) * 128)

    row_budget = max(1, max_tile_bytes // (tile_n * dtype_bytes))
    if row_budget >= M:
        tile_m = M                                      # full dim: layout-legal
    else:
        tile_m = max(8, (row_budget // 8) * 8)          # multiple of 8

    # Megacore: guarantee >= 2 grid blocks when everything fit one tile.
    if tile_m == M and tile_n == N:
        if M >= 16:
            tile_m = (((M + 1) // 2 + 7) // 8) * 8      # < M, multiple of 8
        elif N >= 256:
            tile_n = (((N + 1) // 2 + 127) // 128) * 128  # < N, multiple of 128
    return tile_m, tile_n


def tanh_backward(grad_out: jax.Array, output: jax.Array) -> jax.Array:
    assert grad_out.shape == output.shape
    assert grad_out.dtype == output.dtype == jnp.float32
    M, N = grad_out.shape

    # Tiny inputs: pallas_call fixed overhead dominates; XLA fused op wins.
    if M * N <= _TINY_BYPASS_ELEMS:
        return grad_out * (1.0 - output * output)

    # Lane-dense view when N is not 128-aligned (metadata-only reshape of a
    # contiguous row-major buffer; safe for an elementwise op).
    dense = _lane_dense_dims(M, N)
    g, o = grad_out, output
    if dense is not None:
        g = g.reshape(dense)
        o = o.reshape(dense)
    Mk, Nk = g.shape

    tile_m, tile_n = _choose_tiles(Mk, Nk)
    grid = (pl.cdiv(Mk, tile_m), pl.cdiv(Nk, tile_n))
    spec = pl.BlockSpec((tile_m, tile_n), lambda i, j: (i, j))

    res = pl.pallas_call(
        _tanh_backward_kernel,
        out_shape=jax.ShapeDtypeStruct((Mk, Nk), jnp.float32),
        grid_spec=pltpu.PrefetchScalarGridSpec(
            num_scalar_prefetch=0,
            grid=grid,
            in_specs=[spec, spec],
            out_specs=spec,
        ),
        compiler_params=pltpu.CompilerParams(
            dimension_semantics=("parallel", "parallel"),
            vmem_limit_bytes=_VMEM_LIMIT_BYTES),
        cost_estimate=pl.CostEstimate(
            flops=3 * M * N,
            transcendentals=0,
            bytes_accessed=3 * M * N * 4),
    )(g, o)

    if dense is not None:
        res = res.reshape((M, N))
    return res


def _check(shape, k_g, k_o):
    g = jax.random.normal(k_g, shape, dtype=jnp.float32)
    o = jnp.tanh(jax.random.normal(k_o, shape, dtype=jnp.float32))
    r = tanh_backward(g, o)
    jax.block_until_ready(r)
    ref = g * (1.0 - o * o)
    assert r.shape == ref.shape
    assert jnp.allclose(r, ref, atol=1e-6, rtol=1e-6), f"mismatch at {shape}"


if __name__ == "__main__":
    key = jax.random.PRNGKey(0)
    keys = jax.random.split(key, 8)

    # Primary small shape consistent with the module's ([-1, -1], f32) signature
    # (takes the tiny-input fused-XLA path).
    _check((8, 32), keys[0], keys[1])

    # Odd-sized shape: Pallas path, non-128-aligned N handled via full-dim
    # blocks + megacore M split.
    _check((100, 200), keys[2], keys[3])

    # Non-aligned N whose total is 128-divisible: exercises the lane-dense
    # reshape path.
    _check((256, 200), keys[4], keys[5])

    # 128-aligned medium shape: single-slab full-row tiles + megacore split.
    _check((512, 512), keys[6], keys[7])

    print("KERNEL_OK")
</pallas_src>

<mosaic_0001>
module attributes {stable_mosaic.version = 11 : i64} {
  func.func @_tanh_backward_kernel(%arg0: i32, %arg1: i32, %arg2: memref<56x200xf32, #tpu.memory_space<vmem>>, %arg3: memref<56x200xf32, #tpu.memory_space<vmem>>, %arg4: memref<56x200xf32, #tpu.memory_space<vmem>>) attributes {dimension_semantics = [#tpu.dimension_semantics<parallel>, #tpu.dimension_semantics<parallel>], iteration_bounds = array<i64: 2, 1>, scalar_prefetch = 0 : i64, scratch_operands = 0 : i64, tpu.core_type = #tpu.core_type<tc>, window_params = [{transform_indices = @transform_0, window_bounds = array<i64: 56, 200>}, {transform_indices = @transform_1, window_bounds = array<i64: 56, 200>}, {transform_indices = @transform_2, window_bounds = array<i64: 56, 200>}]} {
    %c0 = arith.constant 0 : index
    %c0_0 = arith.constant 0 : index
    %0 = vector.load %arg2[%c0, %c0_0] : memref<56x200xf32, #tpu.memory_space<vmem>>, vector<56x200xf32>
    %c0_1 = arith.constant 0 : index
    %c0_2 = arith.constant 0 : index
    %1 = vector.load %arg3[%c0_1, %c0_2] : memref<56x200xf32, #tpu.memory_space<vmem>>, vector<56x200xf32>
    %2 = arith.mulf %1, %1 : vector<56x200xf32>
    %cst = arith.constant 1.000000e+00 : f32
    %3 = vector.broadcast %cst : f32 to vector<56x200xf32>
    %4 = arith.subf %3, %2 : vector<56x200xf32>
    %5 = arith.mulf %0, %4 : vector<56x200xf32>
    %c0_3 = arith.constant 0 : index
    %c0_4 = arith.constant 0 : index
    %6 = vector.load %arg4[%c0_3, %c0_4] : memref<56x200xf32, #tpu.memory_space<vmem>>, vector<56x200xf32>
    tpu.vector_store %arg4[%c0_3, %c0_4], %5 {strides = array<i32>} : memref<56x200xf32, #tpu.memory_space<vmem>>, vector<56x200xf32>,
    return
  }
  func.func @transform_0(%arg0: i32, %arg1: i32) -> (i32, i32) {
    %c0_i32 = arith.constant 0 : i32
    return %arg0, %arg1 : i32, i32
  }
  func.func @transform_1(%arg0: i32, %arg1: i32) -> (i32, i32) {
    %c0_i32 = arith.constant 0 : i32
    return %arg0, %arg1 : i32, i32
  }
  func.func @transform_2(%arg0: i32, %arg1: i32) -> (i32, i32) {
    %c0_i32 = arith.constant 0 : i32
    return %arg0, %arg1 : i32, i32
  }
}

</mosaic_0001>

<bundles_post_ra>
// kernel: tpu_custom_call.1
= control target key start
LH: loop header
LB: loop body
LE: loop exit
PB: predicated region body
PF: predicated region fallthrough
CT: control target
= control target key end

     0   :  { %s836_s9 = smov 0   ;;  %s838_s10 = smov 0   ;;  %s1049_s0 = inlined_call_operand.vmem [shape: f32[100,200], index: 0, kind: input, shape index: {}]   ;;  %s1050_s1 = inlined_call_operand.vmem [shape: f32[100,200], index: 1, kind: input, shape index: {}]   ;;  %s1051_s2 = inlined_call_operand.vmem [shape: f32[100,200], index: 2, kind: output, shape index: {}]  }
   0x1   :  { %s840_s11 = smov 0   ;;  %s842_s12 = smov 0  }
   0x2   :  { %s844_s13 = smov 0  }
   0x3 LB: > { %s578_s14 = sadd.s32 4294967295, %s787_s13   ;;  %s24_s15 = sadd.s32 1, %s783_s12  ;;  %s787_s13 = sphi %s844_s13, %s12_s13   ;;  %s783_s12 = sphi %s842_s12, %s1059_s12   ;;  %s779_s11 = sphi %s840_s11, %s1058_s11   ;;  %s775_s10 = sphi %s838_s10, %s1057_s10   ;;  %s771_s9 = sphi %s836_s9, %s1056_s9  }
   0x4   : > { %p26_p0 = scmp.ge.s32.totalorder %s24_s15, 2  ;;  %s89_s16 = sadd.s32 1, %s775_s10 }
   0x5   : > { %p99_p1 = scmp.ne.s32.totalorder %s775_s10, %s771_s9  ;;  %p100_p2 = scmp.eq.s32.totalorder %s578_s14, 1 }
   0x6   : > { %s1061_s15 = smov (%p26_p0, %s24_s15), 0  ;;  %p582_p4 = scmp.ge.s32.totalorder %s787_s13, 1 }
   0x7   : > { %p865_p3 = por %p100_p2, %p99_p1  ;;  %s84_s18 = ssub.s32 %s783_s12, %s1061_s15 }
   0x8   : > { %p174_p5 = scmp.lt.s32.totalorder %s787_s13, 3  ;;  %p87_p6 = scmp.eq.s32.totalorder %s84_s18, 0 }
   0xa   : > { %p175_p7 = pnand %p582_p4, %p174_p5 }
   0xb   : > { %s874_s19 = scalar_select %p87_p6, %s775_s10, %s89_s16  }
   0xc   : > { %178 = sbr.rel (%p175_p7) target bundleno = 101 (0x65), region = 28  ;;  %s217_s22 = sand.u32 (!%p175_p7), 1, %s771_s9   ;;  %vm342_vm0 = vcmask (!%p175_p7), 588800  }
   0xd   : > { %s877_s20 = smul.u32 (!%p175_p7), 7, %s779_s11 }
   0xe   : > { %s891_s30 = smul.u32 (!%p175_p7), 112, %s217_s22 }
   0xf   : > { %p227_p8 = scmp.lt.s32.totalorder (!%p175_p7), %s877_s20, 12 }
  0x10   : > { %s911_s3 = scalar_lea.vmem (!%p175_p7), [#allocation2], %s891_s30  }
  0x13   : > { %s228_s21 = scalar_select %p227_p8, %s877_s20, 12 }
  0x14   : > { %s365_s4 = ssub.s32 (%p865_p3), 13, %s877_s20  ;;  %s606_s5 = smul.u32 (%p865_p3), 112, %s779_s11 }
  0x15   : > { %s601_s23 = sshll.u32 %s228_s21, 4  ;;  %p366_p9 = scmp.lt.s32.totalorder (%p865_p3), %s365_s4, 7 }
  0x16   : > { %s884_s26 = scalar_lea.vmem %s1049_s0, %s601_s23  ;;  %s889_s29 = scalar_lea.vmem %s1050_s1, %s601_s23 }
  0x17   : > { %v285_v0 = vld [vmem:[%s889_s29] sm:$0xff]  ;;  %v286_v2 = vld [vmem:[%s889_s29 + $0x8] sm:$0xff]  ;;  %v287_v3 = vld [vmem:[%s889_s29 + $0x10] sm:$0xff]  ;;  %s952_s8 = scalar_lea.vmem (%p865_p3), %s1051_s2, %s606_s5  }
  0x18   : > { %v299_v1 = vmul.f32 %v285_v0, %v285_v0  ;;  %v271_v4 = vld [vmem:[%s884_s26] sm:$0xff]  ;;  %v272_v5 = vld [vmem:[%s884_s26 + $0x8] sm:$0xff]  ;;  %v300_v6 = vmul.f32 %v286_v2, %v286_v2  ;;  %v301_v7 = vmul.f32 %v287_v3, %v287_v3  ;;  %v288_v8 = vld [vmem:[%s889_s29 + $0x18] sm:$0xff] }
  0x19   : > { %v273_v10 = vld [vmem:[%s884_s26 + $0x10] sm:$0xff]  ;;  %v302_v11 = vmul.f32 %v288_v8, %v288_v8  ;;  %v289_v12 = vld [vmem:[%s889_s29 + $0x20] sm:$0xff]  ;;  %v290_v13 = vld [vmem:[%s889_s29 + $0x28] sm:$0xff] }
  0x1a   : > { %v313_v9 = vsub.f32 1.0, %v299_v1  ;;  %v314_v14 = vsub.f32 1.0, %v300_v6  ;;  %v315_v15 = vsub.f32 1.0, %v301_v7  ;;  %v274_v16 = vld [vmem:[%s884_s26 + $0x18] sm:$0xff]  ;;  %v275_v17 = vld [vmem:[%s884_s26 + $0x20] sm:$0xff]  ;;  %v303_v18 = vmul.f32 %v289_v12, %v289_v12  ;;  %v291_v20 = vld [vmem:[%s889_s29 + $0x30] sm:$0xff] }
  0x1b   : > { %v304_v19 = vmul.f32 %v290_v13, %v290_v13  ;;  %v316_v22 = vsub.f32 1.0, %v302_v11  ;;  %v276_v23 = vld [vmem:[%s884_s26 + $0x28] sm:$0xff]  ;;  %v305_v24 = vmul.f32 %v291_v20, %v291_v20  ;;  %v292_v25 = vld [vmem:[%s889_s29 + $0x38] sm:$0xff]  ;;  %v293_v26 = vld [vmem:[%s889_s29 + $0x40] sm:$0xff] }
  0x1c   : > { %v327_v21 = vmul.f32 %v313_v9, %v271_v4  ;;  %v328_v27 = vmul.f32 %v314_v14, %v272_v5  ;;  %v329_v28 = vmul.f32 %v315_v15, %v273_v10  ;;  %v317_v29 = vsub.f32 1.0, %v303_v18  ;;  %v277_v31 = vld [vmem:[%s884_s26 + $0x30] sm:$0xff]  ;;  %v294_v32 = vld [vmem:[%s889_s29 + $0x48] sm:$0xff]  ;;  %v296_v38 = vld [vmem:[%s889_s29 + $0x58] sm:$0xff] }
  0x1d   : > { %v318_v30 = vsub.f32 1.0, %v304_v19  ;;  %v330_v33 = vmul.f32 %v316_v22, %v274_v16  ;;  %v319_v34 = vsub.f32 1.0, %v305_v24  ;;  %v306_v35 = vmul.f32 %v292_v25, %v292_v25  ;;  %v295_v37 = vld [vmem:[%s889_s29 + $0x50] sm:$0xff]  ;;  %v278_v41 = vld [vmem:[%s884_s26 + $0x38] sm:$0xff]  ;;  %v279_v42 = vld [vmem:[%s884_s26 + $0x40] sm:$0xff] }
  0x1e   : > { %341 = vst [vmem:[%s911_s3] sm:$0xff] %v327_v21  ;;  %v307_v36 = vmul.f32 %v293_v26, %v293_v26  ;;  %343 = vst.msk [vmem:[%s911_s3 + $0x8] sm:$0xff] %vm342_vm0, %v328_v27  ;;  %v331_v39 = vmul.f32 %v317_v29, %v275_v17  ;;  %v308_v43 = vmul.f32 %v294_v32, %v294_v32  ;;  %v297_v45 = vld [vmem:[%s889_s29 + $0x60] sm:$0xff]  ;;  %v280_v49 = vld [vmem:[%s884_s26 + $0x48] sm:$0xff] }
  0x1f   : > { %344 = vst [vmem:[%s911_s3 + $0x10] sm:$0xff] %v329_v28  ;;  %v332_v40 = vmul.f32 %v318_v30, %v276_v23  ;;  %v309_v44 = vmul.f32 %v295_v37, %v295_v37  ;;  %345 = vst.msk [vmem:[%s911_s3 + $0x18] sm:$0xff] %vm342_vm0, %v330_v33  ;;  %v333_v46 = vmul.f32 %v319_v34, %v277_v31  ;;  %v320_v47 = vsub.f32 1.0, %v306_v35  ;;  %v281_v50 = vld [vmem:[%s884_s26 + $0x50] sm:$0xff]  ;;  %v298_v52 = vld [vmem:[%s889_s29 + $0x68] sm:$0xff] }
  0x20   : > { %v321_v48 = vsub.f32 1.0, %v307_v36  ;;  %v310_v51 = vmul.f32 %v296_v38, %v296_v38  ;;  %346 = vst [vmem:[%s911_s3 + $0x20] sm:$0xff] %v331_v39  ;;  %v322_v53 = vsub.f32 1.0, %v308_v43  ;;  %v282_v55 = vld [vmem:[%s884_s26 + $0x58] sm:$0xff]  ;;  %v311_v56 = vmul.f32 %v297_v45, %v297_v45  ;;  %v283_v61 = vld [vmem:[%s884_s26 + $0x60] sm:$0xff]  ;;  %v284_v62 = vld [vmem:[%s884_s26 + $0x68] sm:$0xff] }
  0x21   : > { %347 = vst.msk [vmem:[%s911_s3 + $0x28] sm:$0xff] %vm342_vm0, %v332_v40  ;;  %v323_v54 = vsub.f32 1.0, %v309_v44  ;;  %v312_v57 = vmul.f32 %v298_v52, %v298_v52  ;;  %348 = vst [vmem:[%s911_s3 + $0x30] sm:$0xff] %v333_v46  ;;  %v334_v58 = vmul.f32 %v320_v47, %v278_v41  ;;  %362 = sbr.rel (!%p865_p3) target bundleno = 101 (0x65), region = 32 }
  0x22   : > { %v335_v59 = vmul.f32 %v321_v48, %v279_v42  ;;  %v324_v60 = vsub.f32 1.0, %v310_v51  ;;  %v336_v63 = vmul.f32 %v322_v53, %v280_v49  ;;  %v325_v1 = vsub.f32 1.0, %v311_v56 }
  0x23   : > { %v337_v0 = vmul.f32 %v323_v54, %v281_v50  ;;  %v326_v2 = vsub.f32 1.0, %v312_v57  ;;  %349 = vst.msk [vmem:[%s911_s3 + $0x38] sm:$0xff] %vm342_vm0, %v334_v58 }
  0x24   : > { %350 = vst [vmem:[%s911_s3 + $0x40] sm:$0xff] %v335_v59  ;;  %v338_v3 = vmul.f32 %v324_v60, %v282_v55  ;;  %351 = vst.msk [vmem:[%s911_s3 + $0x48] sm:$0xff] %vm342_vm0, %v336_v63  ;;  %v339_v4 = vmul.f32 %v325_v1, %v283_v61 }
  0x25   : > { %352 = vst [vmem:[%s911_s3 + $0x50] sm:$0xff] %v337_v0  ;;  %v340_v5 = vmul.f32 %v326_v2, %v284_v62 }
  0x26   : > { %353 = vst.msk [vmem:[%s911_s3 + $0x58] sm:$0xff] %vm342_vm0, %v338_v3  ;;  %354 = vst [vmem:[%s911_s3 + $0x60] sm:$0xff] %v339_v4 }
  0x27   : > { %355 = vst.msk [vmem:[%s911_s3 + $0x68] sm:$0xff] %vm342_vm0, %v340_v5 }
  0x28   : > { %s1063_s4 = smov (!%p366_p9, %s365_s4), 7 }
  0x29   : > { %s603_s9 = sshll.u32 %s1063_s4, 8 }
  0x2a   : > { %p592_p10 = scmp.eq.s32.totalorder %s603_s9, 0 }
  0x2b   : > { %713 = sdivrem.u32 (!%p592_p10), %s1063_s4, 7 }
  0x2c   : > { %377 = sbr.rel (%p592_p10) target bundleno = 101 (0x65), region = 36 }
  0x34   : > { %s958_s14 = spop.drf %713 }
  0x35   : > { %p593_p11 = scmp.le.s32.totalorder %s958_s14, 0 }
  0x36   : > { %s1053_s11 = smov (!%p593_p11), %s952_s8  ;;  %s1054_s16 = smov (!%p593_p11), %s911_s3 }
  0x37   : > { %520 = sbr.rel (%p593_p11) target bundleno = 72 (0x48), region = 87  ;;  %s967_s17 = smov (!%p593_p11), 0  }
  0x38   : > { %s969_s18 = smov (!%p593_p11), 0  }
  0x3e LB: >> { %v391_v6 = vld [vmem:[%s795_s16] sm:$0xff]  ;;  %v393_v7 = vld [vmem:[%s795_s16 + $0x10] sm:$0xff]  ;;  %s419_s20 = sadd.s32 1, %s799_s17  ;;  %v405_v13 = vld [vmem:[%s795_s16 + $0x8] sm:$0xff]  ;;  %s385_s18 = sadd.s32 1, %s803_s18   ;;  %s803_s18 = sphi %s969_s18, %s385_s18   ;;  %s799_s17 = sphi %s967_s17, %s1055_s17   ;;  %s795_s16 = sphi %s1054_s16, %s424_s16   ;;  %s791_s11 = sphi %s1053_s11, %s425_s11  }
  0x3f   : >> { %v395_v8 = vld [vmem:[%s795_s16 + $0x20] sm:$0xff]  ;;  %392 = vst [vmem:[%s791_s11] sm:$0xff] %v391_v6  ;;  %394 = vst [vmem:[%s791_s11 + $0x10] sm:$0xff] %v393_v7  ;;  %v397_v9 = vld [vmem:[%s795_s16 + $0x30] sm:$0xff]  ;;  %p420_p12 = scmp.ge.s32.totalorder %s419_s20, %s958_s14  ;;  %p384_p13 = scmp.ge.s32.totalorder %s385_s18, %s958_s14 }
  0x40   : >> { %396 = vst [vmem:[%s791_s11 + $0x20] sm:$0xff] %v395_v8  ;;  %v399_v10 = vld [vmem:[%s795_s16 + $0x40] sm:$0xff]  ;;  %v401_v11 = vld [vmem:[%s795_s16 + $0x50] sm:$0xff]  ;;  %398 = vst [vmem:[%s791_s11 + $0x30] sm:$0xff] %v397_v9 }
  0x41   : >> { %400 = vst [vmem:[%s791_s11 + $0x40] sm:$0xff] %v399_v10  ;;  %402 = vst [vmem:[%s791_s11 + $0x50] sm:$0xff] %v401_v11  ;;  %v403_v12 = vld [vmem:[%s795_s16 + $0x60] sm:$0xff]  ;;  %v407_v14 = vld [vmem:[%s795_s16 + $0x18] sm:$0xff]  ;;  %s1065_s20 = smov (%p420_p12, %s419_s20), 0  ;;  %387 = sbr.rel (!%p384_p13) target bundleno = 62 (0x3e), region = 93 }
  0x42   : >> { %404 = vst [vmem:[%s791_s11 + $0x60] sm:$0xff] %v403_v12  ;;  %406 = vst [vmem:[%s791_s11 + $0x8] sm:$0xff] %v405_v13  ;;  %v409_v15 = vld [vmem:[%s795_s16 + $0x28] sm:$0xff]  ;;  %v411_v16 = vld [vmem:[%s795_s16 + $0x38] sm:$0xff]  ;;  %s422_s21 = smul.u32 112, %s1065_s20  ;;  %s1055_s17 = smov %s1065_s20 }
  0x43   : >> { %408 = vst [vmem:[%s791_s11 + $0x18] sm:$0xff] %v407_v14  ;;  %v413_v17 = vld [vmem:[%s795_s16 + $0x48] sm:$0xff]  ;;  %410 = vst [vmem:[%s791_s11 + $0x28] sm:$0xff] %v409_v15  ;;  %v415_v18 = vld [vmem:[%s795_s16 + $0x58] sm:$0xff] }
  0x44   : >> { %412 = vst [vmem:[%s791_s11 + $0x38] sm:$0xff] %v411_v16  ;;  %414 = vst [vmem:[%s791_s11 + $0x48] sm:$0xff] %v413_v17  ;;  %v417_v19 = vld [vmem:[%s795_s16 + $0x68] sm:$0xff]  ;;  %s424_s16 = scalar_lea.vmem %s911_s3, %s422_s21 [#allocation2]  }
  0x45   : >> { %416 = vst [vmem:[%s791_s11 + $0x58] sm:$0xff] %v415_v18  ;;  %418 = vst [vmem:[%s791_s11 + $0x68] sm:$0xff] %v417_v19  ;;  %s425_s11 = scalar_lea.vmem %s952_s8, %s422_s21  }
  0x48 PF: > { %715 = sdivrem.u32 %s1063_s4, 7 }
  0x49   : > { %s594_s22 = smul.u32 112, %s958_s14 }
  0x4b   : > { %s1025_s23 = scalar_lea.vmem %s911_s3, %s594_s22 [#allocation2]   ;;  %s1028_s24 = scalar_lea.vmem %s952_s8, %s594_s22  }
  0x51   : > { %s716_s25 = spop.drf %715 }
  0x52   : > { %p596_p0 = scmp.le.s32.totalorder %s716_s25, 0 }
  0x53   : > { %s805_s26 = smov (!%p596_p0), %s1028_s24   ;;  %s809_s27 = smov (!%p596_p0), %s1025_s23  }
  0x54   : > { %534 = sbr.rel (%p596_p0) target bundleno = 101 (0x65), region = 98  ;;  %s813_s28 = smov (!%p596_p0), 0  }
  0x55   : > { %s817_s29 = smov (!%p596_p0), 0  }
  0x5b LB: >> { %v442_v20 = vld [vmem:[%s811_s27] sm:$0xff]  ;;  %v444_v21 = vld [vmem:[%s811_s27 + $0x8] sm:$0xff]  ;;  %s446_s30 = sadd.s32 1, %s815_s28  ;;  %s436_s29 = sadd.s32 1, %s819_s29   ;;  %s819_s29 = sphi %s817_s29, %s436_s29   ;;  %s815_s28 = sphi %s813_s28, %s814_s28   ;;  %s811_s27 = sphi %s809_s27, %s451_s27   ;;  %s807_s26 = sphi %s805_s26, %s452_s26  }
  0x5c   : >> { %443 = vst [vmem:[%s807_s26] sm:$0xff] %v442_v20  ;;  %445 = vst [vmem:[%s807_s26 + $0x8] sm:$0xff] %v444_v21  ;;  %p447_p1 = scmp.ge.s32.totalorder %s446_s30, %s716_s25  ;;  %p435_p2 = scmp.ge.s32.totalorder %s436_s29, %s716_s25 }
  0x5e   : >> { %s1067_s30 = smov (%p447_p1, %s446_s30), 0  ;;  %438 = sbr.rel (!%p435_p2) target bundleno = 91 (0x5b), region = 104 }
  0x5f   : >> { %s597_s3 = sshll.u32 %s1067_s30, 4  ;;  %s814_s28 = smov %s1067_s30  }
  0x60   : >> { %s451_s27 = scalar_lea.vmem %s1025_s23, %s597_s3 [#allocation2]   ;;  %s452_s26 = scalar_lea.vmem %s1028_s24, %s597_s3  }
  0x65 PF: > { %s12_s13 = sadd.s32 1, %s787_s13   ;;  %s1056_s9 = smov %s775_s10 }
  0x66   : > { %p9_p3 = scmp.ge.s32.totalorder %s12_s13, 4   ;;  %s1057_s10 = smov %s874_s19 }
  0x67   : > { %s1058_s11 = smov %s783_s12  ;;  %s1059_s12 = smov %s1061_s15 }
  0x68   :  { %11 = sbr.rel (!%p9_p3) target bundleno = 3 (0x3), region = 115 }

</bundles_post_ra>
